<compile_context>
chip_gen: v7x
topology: tpu7x:2x2x1
jax: 0.10.0
libtpu: 0.0.40
codegen_flags: <defaults>
</compile_context>

<pallas_src>
import functools

import jax
import jax.numpy as jnp
from jax import lax
from jax.experimental import pallas as pl
from jax.experimental.pallas import tpu as pltpu


# contract dim 0 of both operands: att[i, j] = sum_a f[a, i] * g[a, j]
_TN_DIM_NUMBERS = (((0,), (0,)), ((), ()))

_MATMUL_DTYPE = jnp.bfloat16   # MXU-native on v5e/v6e/v7x


def _self_attention_kernel(f_ref, g_ref, out_ref):
    fT = f_ref[0]        # (A, N)  bf16, constant index across j -> resident per batch
    gj = g_ref[0]        # (A, TJ) bf16, current column tile

    # att[i, j] = sum_a f[a, i] * g[a, j]  -> (N, TJ) lane-dense MXU output,
    # bf16 operands, f32 accumulation.
    att = lax.dot_general(fT, gj, _TN_DIM_NUMBERS,
                          preferred_element_type=jnp.float32)   # (N, TJ)

    # torch.softmax(att, dim=1): normalize over the row axis i.  Every column
    # tile holds all N rows, so the softmax is fully local to this block.
    m = jnp.max(att, axis=0, keepdims=True)
    e = jnp.exp(att - m)
    s = jnp.sum(e, axis=0, keepdims=True)
    inv = pl.reciprocal(s, approx=True)        # EUP slot, only TJ elements
    out_ref[0] = (e * inv).astype(out_ref.dtype)


def _vmem_capacity_bytes() -> int:
    try:
        return int(pltpu.get_tpu_info().vmem_capacity_bytes)
    except Exception:  # pragma: no cover - fallback when info is unavailable
        return 64 * 1024 * 1024    # conservative: v7x per-TensorCore VMEM


def _pick_col_tile(n: int, batch: int, a: int,
                   in_itemsize: int, out_itemsize: int,
                   vmem_budget: int) -> int:
    """Column-tile width TJ for the (N, N) attention output.

    Per-grid-step VMEM accounting:
      resident f block (double-buffered):  2 * A * N  * in_itemsize   (fixed)
      g tile           (double-buffered):  2 * A * TJ * in_itemsize
      out tile         (double-buffered):  2 * N * TJ * out_itemsize
      f32 in-kernel temporaries (att, e):  2 * N * TJ * 4
    TJ stays a multiple of 128 (lane-dense, unmasked stores) and a divisor of
    N; prefer >= 2 column tiles (and >= 2 total grid steps) so the pipeline /
    both v7x TensorCores have work even when batch == 1.
    """
    if n % 128 != 0:
        return n                                # tiny / odd N: one full block

    fixed = 2 * a * n * in_itemsize
    per_col = 2 * a * in_itemsize + 2 * n * out_itemsize + 2 * n * 4
    avail = max(vmem_budget - fixed, per_col * 128)
    tj = min(n, max(128, (avail // per_col) // 128 * 128))
    while n % tj != 0:                          # snap to a divisor of N
        tj -= 128

    def _can_halve(t):
        return t % 2 == 0 and (t // 2) % 128 == 0

    while n // tj < 2 and _can_halve(tj):       # >=2 column tiles if possible
        tj //= 2
    while batch * (n // tj) < 2 and _can_halve(tj):
        tj //= 2
    return tj


@functools.partial(jax.jit, static_argnames=("out_dtype",))
def self_attention(x_nchw, wf, bf, wg, bg, out_dtype=None):
    """att = softmax(bmm(conv_f(x)^T_flat, conv_g(x)_flat), dim=1) -> (B, N, N)."""
    B, C, W, H = x_nchw.shape
    N = W * H
    A = wf.shape[0]
    out_dtype = x_nchw.dtype if out_dtype is None else jnp.dtype(out_dtype)

    # NCHW -> (B, C, N) is a free reshape (same layout as torch's .view).
    x = x_nchw.reshape(B, C, N)

    # Hoisted 1x1-conv projections: one tiny XLA matmul each (2*B*N*C*A FLOPs
    # total), computed once instead of once per column tile; cast to bf16 so
    # the in-kernel MXU path and the resident f block are both bf16.
    f = (jnp.einsum("ac,bcn->ban", wf, x) + bf[None]).astype(_MATMUL_DTYPE)
    g = (jnp.einsum("ac,bcn->ban", wg, x) + bg[None]).astype(_MATMUL_DTYPE)

    in_itemsize = jnp.dtype(_MATMUL_DTYPE).itemsize
    out_itemsize = jnp.dtype(out_dtype).itemsize

    vmem_cap = _vmem_capacity_bytes()
    tj = _pick_col_tile(N, B, A, in_itemsize, out_itemsize,
                        vmem_budget=int(0.75 * vmem_cap))
    n_j = N // tj

    footprint = (2 * A * N * in_itemsize        # resident f (double-buffered)
                 + 2 * A * tj * in_itemsize     # g tile
                 + 2 * N * tj * out_itemsize    # out tile
                 + 2 * N * tj * 4)              # f32 temporaries (att, e)
    vmem_limit = int(min(vmem_cap, max(footprint + (8 << 20), 16 << 20)))

    flops = 2 * B * N * N * A                   # attention matmul (in-kernel)
    bytes_accessed = (2 * B * A * N * in_itemsize   # f + g reads
                      + B * N * N * out_itemsize)   # attention-map write

    # TODO(synk): spectral_norm's power iteration is a train-time weight
    # reparameterization; weights are expected pre-normalized (host-side SVD).
    # TODO(synk): for very large N (>= ~8192) add a row-chunk grid axis with an
    # online column softmax to bound the f32 (N, TJ) temporaries on v7x VMEM.
    return pl.pallas_call(
        _self_attention_kernel,
        out_shape=jax.ShapeDtypeStruct((B, N, N), out_dtype),
        grid=(B, n_j),
        in_specs=[
            pl.BlockSpec((1, A, N), lambda b, j: (b, 0, 0)),    # f, resident
            pl.BlockSpec((1, A, tj), lambda b, j: (b, 0, j)),   # g column tile
        ],
        out_specs=pl.BlockSpec((1, N, tj), lambda b, j: (b, 0, j)),
        compiler_params=pltpu.CompilerParams(
            dimension_semantics=("parallel", "parallel"),
            vmem_limit_bytes=vmem_limit),
        cost_estimate=pl.CostEstimate(
            flops=flops, transcendentals=B * N * N,
            bytes_accessed=bytes_accessed),
    )(f, g)


def _spectral_normalize(w_mat):
    # spectral_norm divides the (out, in) weight matrix by its largest singular
    # value (PyTorch approximates via power iteration; exact SVD here).
    sigma = jnp.linalg.svd(w_mat, compute_uv=False)[0]
    return w_mat / sigma


def init_params(key, input_size, attention_size):
    kf_w, kf_b, kg_w, kg_b = jax.random.split(key, 4)
    wf = _spectral_normalize(
        jax.random.normal(kf_w, (attention_size, input_size), jnp.float32) * 0.5)
    wg = _spectral_normalize(
        jax.random.normal(kg_w, (attention_size, input_size), jnp.float32) * 0.5)
    bf = jax.random.normal(kf_b, (attention_size, 1), jnp.float32) * 0.1
    bg = jax.random.normal(kg_b, (attention_size, 1), jnp.float32) * 0.1
    return dict(wf=wf, bf=bf, wg=wg, bg=bg)


def reference_forward(x_nchw, p):
    # Pure-JAX (f32) replica of the PyTorch graph, for verification.
    B, C, W, H = x_nchw.shape
    N = W * H
    xf = x_nchw.reshape(B, C, N)
    f = jnp.einsum("ac,bcn->ban", p["wf"], xf) + p["bf"][None]   # (B, A, N)
    g = jnp.einsum("ac,bcn->ban", p["wg"], xf) + p["bg"][None]   # (B, A, N)
    fT = jnp.transpose(f, (0, 2, 1))                             # (B, N, A)
    att = jnp.einsum("bia,baj->bij", fT, g)                      # (B, N, N)
    return jax.nn.softmax(att, axis=1)                           # dim=1, like torch


if __name__ == "__main__":
    key = jax.random.PRNGKey(0)
    k_x, k_p = jax.random.split(key)

    B, C, W, H = 2, 4, 16, 16      # input_size=4
    A = 8                          # attention_size=8
    N = W * H

    x = jax.random.normal(k_x, (B, C, W, H), jnp.float32)
    params = init_params(k_p, C, A)

    out = self_attention(x, params["wf"], params["bf"],
                         params["wg"], params["bg"])
    out = jax.block_until_ready(out)

    ref = reference_forward(x, params)
    assert out.shape == (B, N, N)
    assert out.dtype == x.dtype
    # bf16 MXU operands + approx reciprocal -> slightly looser tolerances.
    assert jnp.allclose(out, ref, atol=5e-3, rtol=5e-2), "mismatch vs reference"
    # softmax over dim=1 => each column sums to 1
    assert jnp.allclose(out.sum(axis=1), 1.0, atol=5e-3)

    print("KERNEL_OK")
</pallas_src>

<mosaic_0001>
module attributes {stable_mosaic.version = 11 : i64} {
  func.func @_self_attention_kernel(%arg0: i32, %arg1: i32, %arg2: memref<1x8x256xbf16, #tpu.memory_space<vmem>>, %arg3: memref<1x8x128xbf16, #tpu.memory_space<vmem>>, %arg4: memref<1x256x128xf32, #tpu.memory_space<vmem>>) attributes {dimension_semantics = [#tpu.dimension_semantics<parallel>, #tpu.dimension_semantics<parallel>], iteration_bounds = array<i64: 2, 2>, scalar_prefetch = 0 : i64, scratch_operands = 0 : i64, tpu.core_type = #tpu.core_type<tc>, window_params = [{transform_indices = @transform_0, window_bounds = array<i64: 1, 8, 256>}, {transform_indices = @transform_1, window_bounds = array<i64: 1, 8, 128>}, {transform_indices = @transform_2, window_bounds = array<i64: 1, 256, 128>}]} {
    %c0 = arith.constant 0 : index
    %c0_0 = arith.constant 0 : index
    %c0_1 = arith.constant 0 : index
    %0 = vector.load %arg2[%c0, %c0_0, %c0_1] : memref<1x8x256xbf16, #tpu.memory_space<vmem>>, vector<1x8x256xbf16>
    %1 = vector.shape_cast %0 : vector<1x8x256xbf16> to vector<8x256xbf16>
    %c0_2 = arith.constant 0 : index
    %c0_3 = arith.constant 0 : index
    %c0_4 = arith.constant 0 : index
    %2 = vector.load %arg3[%c0_2, %c0_3, %c0_4] : memref<1x8x128xbf16, #tpu.memory_space<vmem>>, vector<1x8x128xbf16>
    %3 = vector.shape_cast %2 : vector<1x8x128xbf16> to vector<8x128xbf16>
    %cst = arith.constant dense<0.000000e+00> : vector<256x128xf32>
    %4 = tpu.matmul %1, %3, %cst {dimension_numbers = #tpu.dot_dimension_numbers<[0], [0], [1], [1], [0, 1, 1, 1], [], []>} : vector<8x256xbf16>, vector<8x128xbf16>, vector<256x128xf32> -> vector<256x128xf32>
    %cst_5 = arith.constant dense<0xFF800000> : vector<128xf32>
    %5 = vector.multi_reduction <maximumf>, %4, %cst_5 [0] : vector<256x128xf32> to vector<128xf32>
    %6 = vector.shape_cast %5 : vector<128xf32> to vector<1x128xf32>
    %7 = vector.broadcast %6 : vector<1x128xf32> to vector<256x128xf32>
    %8 = arith.subf %4, %7 : vector<256x128xf32>
    %9 = math.exp %8 : vector<256x128xf32>
    %cst_6 = arith.constant dense<0.000000e+00> : vector<128xf32>
    %10 = vector.multi_reduction <add>, %9, %cst_6 [0] : vector<256x128xf32> to vector<128xf32>
    %11 = vector.shape_cast %10 : vector<128xf32> to vector<1x128xf32>
    %12 = tpu.reciprocal %11 {approx = true} : vector<1x128xf32> -> vector<1x128xf32>
    %13 = vector.broadcast %12 : vector<1x128xf32> to vector<256x128xf32>
    %14 = arith.mulf %9, %13 : vector<256x128xf32>
    %c0_7 = arith.constant 0 : index
    %c0_8 = arith.constant 0 : index
    %c0_9 = arith.constant 0 : index
    %15 = vector.load %arg4[%c0_7, %c0_8, %c0_9] : memref<1x256x128xf32, #tpu.memory_space<vmem>>, vector<1x256x128xf32>
    %16 = vector.shape_cast %15 : vector<1x256x128xf32> to vector<256x128xf32>
    %17 = vector.shape_cast %14 : vector<256x128xf32> to vector<1x256x128xf32>
    tpu.vector_store %arg4[%c0_7, %c0_8, %c0_9], %17 {strides = array<i32>} : memref<1x256x128xf32, #tpu.memory_space<vmem>>, vector<1x256x128xf32>,
    return
  }
  func.func @transform_0(%arg0: i32, %arg1: i32) -> (i32, i32, i32) {
    %c0_i32 = arith.constant 0 : i32
    %c0_i32_0 = arith.constant 0 : i32
    %c0_i32_1 = arith.constant 0 : i32
    return %arg0, %c0_i32, %c0_i32_0 : i32, i32, i32
  }
  func.func @transform_1(%arg0: i32, %arg1: i32) -> (i32, i32, i32) {
    %c0_i32 = arith.constant 0 : i32
    %c0_i32_0 = arith.constant 0 : i32
    return %arg0, %c0_i32, %arg1 : i32, i32, i32
  }
  func.func @transform_2(%arg0: i32, %arg1: i32) -> (i32, i32, i32) {
    %c0_i32 = arith.constant 0 : i32
    %c0_i32_0 = arith.constant 0 : i32
    return %arg0, %c0_i32, %arg1 : i32, i32, i32
  }
}

</mosaic_0001>

<bundles_post_ra>
// kernel: self_attention.1
= control target key start
LH: loop header
LB: loop body
LE: loop exit
PB: predicated region body
PF: predicated region fallthrough
CT: control target
= control target key end

     0   :  { %7 = vsyncpa [#allocation3], 0  ;;  %s1668_s0 = inlined_call_operand.vmem [shape: bf16[2,8,256], index: 0, kind: input, shape index: {}]   ;;  %s1669_s1 = inlined_call_operand.vmem [shape: bf16[2,8,256], index: 1, kind: input, shape index: {}]   ;;  %s1670_s2 = inlined_call_operand.hbm [shape: f32[2,256,256], index: 2, kind: output, shape index: {}]  }
   0x1   :  { %9 = vsyncpa [#allocation3 + $0x1], 0  ;;  %s1133_s9 = smov 0   ;;  %s1135_s10 = smov 0  }
   0x2   :  { %s1137_s11 = smov 0   ;;  %s1139_s12 = smov 0  }
   0x3   :  { %s1141_s13 = smov 0   ;;  %s1143_s14 = smov 0  }
   0x4   :  { %s1145_s15 = smov 0   ;;  %s1147_s16 = smov 0  }
   0x5 LB: > { %s786_s17 = sadd.s32 4294967295, %s1112_s16   ;;  %s787_s18 = sadd.s32 4294967294, %s1112_s16   ;;  %s1112_s16 = sphi %s1147_s16, %s15_s16   ;;  %s1108_s15 = sphi %s1145_s15, %s1679_s15   ;;  %s1104_s14 = sphi %s1143_s14, %s1678_s14   ;;  %s1100_s13 = sphi %s1141_s13, %s1677_s13   ;;  %s1096_s12 = sphi %s1139_s12, %s1676_s12   ;;  %s1092_s11 = sphi %s1137_s11, %s1675_s11   ;;  %s1088_s10 = sphi %s1135_s10, %s1674_s10   ;;  %s1084_s9 = sphi %s1133_s9, %s1673_s9  }
   0x6   : > { %s24_s19 = sadd.s32 1, %s1104_s14  ;;  %s27_s20 = sadd.s32 1, %s1108_s15 }
   0x7   : > { %p25_p0 = scmp.ge.s32.totalorder %s24_s19, 2  ;;  %p100_p1 = scmp.ne.s32.totalorder %s1092_s11, %s1088_s10 }
   0x8   : > { %p101_p2 = scmp.eq.s32.totalorder %s786_s17, 3  ;;  %p106_p5 = scmp.ne.s32.totalorder %s1088_s10, %s1084_s9 }
   0x9   : > { %s1681_s19 = smov (%p25_p0, %s24_s19), 0  ;;  %s1683_s20 = smov (!%p25_p0, %s27_s20), %s1108_s15 }
   0xa   : > { %s86_s21 = ssub.s32 %s1104_s14, %s1681_s19  ;;  %p1184_p3 = por %p101_p2, %p100_p1 }
   0xb   : > { %p29_p4 = scmp.ge.s32.totalorder %s1683_s20, 2  ;;  %p107_p6 = scmp.eq.s32.totalorder %s787_s18, 3 }
   0xc   : > { %p790_p7 = scmp.ge.s32.totalorder %s1112_s16, 1  ;;  %p144_p9 = scmp.lt.s32.totalorder %s1112_s16, 5 }
   0xd   : > { %s1685_s20 = smov (%p29_p4, %s1683_s20), 0  ;;  %p1193_p8 = por %p107_p6, %p106_p5 }
   0xe   : > { %s85_s24 = ssub.s32 %s1108_s15, %s1685_s20  ;;  %s90_s25 = sadd.s32 1, %s1092_s11 }
   0xf   : > { %s87_s26 = sor.u32 %s86_s21, %s85_s24  ;;  %p145_p10 = pnand %p790_p7, %p144_p9 }
  0x10   : > { %p88_p11 = scmp.eq.s32.totalorder %s87_s26, 0  ;;  %p174_p12 = scmp.lt.s32.totalorder (!%p145_p10), %s1100_s13, 1  ;;  %vm278_vm0 = vcmask (!%p145_p10), 1043456   ;;  %vm229_vm1 = vcmask (!%p145_p10), 64512  }
  0x11   : > { %148 = sbr.rel (%p145_p10) target bundleno = 568 (0x238), region = 28  ;;  %p181_p13 = scmp.lt.s32.totalorder (!%p145_p10), %s1096_s12, 1 }
  0x12   : > { %s1202_s27 = scalar_select %p88_p11, %s1092_s11, %s90_s25  }
  0x13   : > { %s171_s24 = sand.u32 (!%p145_p10), 1, %s1088_s10   ;;  %s815_s26 = sshll.u32 (!%p145_p10), %s1100_s13, 6 }
  0x14   : > { %s791_s25 = sshll.u32 (!%p145_p10), %s171_s24, 8  ;;  %s1616_s5 = scalar_lea.sflag (!%p145_p10), [#allocation3], %s171_s24 }
  0x18   : > { %s175_s28 = scalar_select %p174_p12, %s1100_s13, 1 }
  0x19   : > { %s182_s29 = scalar_select %p181_p13, %s1096_s12, 1 }
  0x1a   : > { %s819_s30 = sshll.u32 %s175_s28, 3  ;;  %s794_s3 = sshll.u32 %s175_s28, 1 }
  0x1b   : > { %s178_s6 = scalar_lea.vmem %s1668_s0, %s819_s30  ;;  %s184_s7 = sadd.s32 %s794_s3, %s182_s29 }
  0x1c   : > { %v188_v0 = vld [vmem:[%s178_s6] sm:$0xff]  ;;  %s795_s8 = sshll.u32 %s184_s7, 2  ;;  %s1541_s28 = sadd.s32 %s1096_s12, %s815_s26 }
  0x1d   : > { %v796_v1 = vcombine.low %v188_v0, %v188_v0  ;;  %s186_s21 = scalar_lea.vmem %s1669_s1, %s795_s8  ;;  %v797_v4 = vcombine.high %v188_v0, %v188_v0  ;;  %s1547_s29 = scalar_lea.vmem [#allocation2], %s791_s25 }
  0x1e   : > { %v189_v2 = vld [vmem:[%s186_s21] sm:$0xf]  ;;  %s693_s12 = sshll.u32 %s1547_s29, 4  ;;  %s816_s13 = sshll.u32 %s1541_s28, 7  ;;  %s1583_s12 = int_to_ptr.vmem [resolvable:$true] %s693_s12 }
  0x1f   : > { %197 = vxpose.xlu0.c.b16.start.end [1/1] (short) %v796_v1, 128  ;;  %873 = vmatprep.subr.msk.bf16.mxu0 %vm278_vm0, %v189_v2  ;;  %v280_v3 = vsel %vm278_vm0, %v189_v2, 0  ;;  %s1596_s4 = scalar_lea.hbm %s1670_s2, %s816_s13  ;;  %s1018_s6 = scalar_lea.vmem %s1583_s12, 4096 }
  0x20   : > { %838 = vmatpush3.bf16.msra.mxu0 %v280_v3  ;;  %874 = vmatprep.subr.msk.bf16.mxu1 %vm278_vm0, %v189_v2  ;;  %p1019_p0 = scmp.ne.s32.totalorder %s1583_s12, %s1018_s6  ;;  %s1114_s7 = smov [#allocation2]  }
  0x21   : > { %872 = vmatpush3.bf16.msra.mxu1 %v280_v3  ;;  %s1022_s8 = sshll.u32 %s1114_s7, 4  ;;  %s1023_s8 = int_to_ptr.vmem [resolvable:$false] %s1022_s8 }
  0x22   : > { %p1020_p1 = pnand %p1019_p0, %p1184_p3  ;;  %s1024_s17 = scalar_lea.vmem %s1023_s8, 8192 }
  0x23   : > { %p1025_p4 = scmp.lt.s32.totalorder %s1583_s12, %s1023_s8  ;;  %p1026_p5 = scmp.lt.s32.totalorder %s1024_s17, %s1018_s6 }
  0x24   : > { %p1021_p2 = pneg %p1020_p1 }
  0x25   : > { %p1027_p6 = por %p1026_p5, %p1025_p4 }
  0x27   : > { %p1028_p7 = pnand %p1027_p6, %p1021_p2 }
  0x3c   : > { %213 = vxpose.xlu0.c.b16.start.end [1/1] (short) %v797_v4, 128 }
  0x85   : > { %v205_v5 = vpop.trf.xlu0 }
  0x86   : > { %839 = vmatprep.mubr.msk.bf16.mxu0 %vm229_vm1, %v205_v5 }
  0x89   : > { %v206_v6 = vpop.trf.xlu0 }
  0x8a   : > { %840 = vmatmul.mubr.msk.bf16.vlgmr.msra.gmra.mrb[0].mxu0 %vm229_vm1, %v206_v6 }
  0x8d   : > { %v207_v7 = vpop.trf.xlu0 }
  0x8e   : > { %843 = vmatprep.mubr.msk.bf16.mxu0 %vm229_vm1, %v207_v7 }
  0x91   : > { %v208_v8 = vpop.trf.xlu0 }
  0x92   : > { %844 = vmatmul.mubr.msk.bf16.gmra.mrb[4].mxu0 %vm229_vm1, %v208_v8 }
  0x95   : > { %v209_v9 = vpop.trf.xlu0 }
  0x96   : > { %847 = vmatprep.mubr.msk.bf16.mxu0 %vm229_vm1, %v209_v9 }
  0x99   : > { %v210_v10 = vpop.trf.xlu0 }
  0x9a   : > { %848 = vmatmul.mubr.msk.bf16.gmra.mrb[8].mxu0 %vm229_vm1, %v210_v10 }
  0x9d   : > { %v211_v11 = vpop.trf.xlu0 }
  0x9e   : > { %851 = vmatprep.mubr.msk.bf16.mxu0 %vm229_vm1, %v211_v11 }
  0xa1   : > { %v212_v12 = vpop.trf.xlu0 }
  0xa2   : > { %852 = vmatmul.mubr.msk.bf16.gmra.mrb[12].mxu0 %vm229_vm1, %v212_v12 }
  0xa5   : > { %v221_v13 = vpop.trf.xlu0 }
  0xa6   : > { %855 = vmatprep.mubr.msk.bf16.mxu1 %vm229_vm1, %v221_v13 }
  0xa9   : > { %v222_v14 = vpop.trf.xlu0 }
  0xaa   : > { %856 = vmatmul.mubr.msk.bf16.vlgmr.msra.gmra.mrb[0].mxu1 %vm229_vm1, %v222_v14 }
  0xad   : > { %v223_v15 = vpop.trf.xlu0 }
  0xae   : > { %859 = vmatprep.mubr.msk.bf16.mxu1 %vm229_vm1, %v223_v15 }
  0xb1   : > { %v224_v16 = vpop.trf.xlu0 }
  0xb2   : > { %860 = vmatmul.mubr.msk.bf16.gmra.mrb[4].mxu1 %vm229_vm1, %v224_v16 }
  0xb5   : > { %v225_v17 = vpop.trf.xlu0 }
  0xb6   : > { %863 = vmatprep.mubr.msk.bf16.mxu1 %vm229_vm1, %v225_v17 }
  0xb9   : > { %v226_v18 = vpop.trf.xlu0 }
  0xba   : > { %864 = vmatmul.mubr.msk.bf16.gmra.mrb[8].mxu1 %vm229_vm1, %v226_v18 }
  0xbd   : > { %v227_v19 = vpop.trf.xlu0 }
  0xbe   : > { %867 = vmatprep.mubr.msk.bf16.mxu1 %vm229_vm1, %v227_v19 }
  0xc1   : > { %v228_v20 = vpop.trf.xlu0 }
  0xc2   : > { %868 = vmatmul.mubr.msk.bf16.gmra.mrb[12].mxu1 %vm229_vm1, %v228_v20 }
 0x15d   : > { %v1230_v21 = vpop.f32.mrb[0].mxu0 }
 0x15e   : > { %v1232_v22 = vpop.f32.mrb[1].mxu0 }
 0x15f   : > { %v1234_v23 = vpop.f32.mrb[2].mxu0 }
 0x160   : > { %v1236_v24 = vpop.f32.mrb[3].mxu0 }
 0x165   : > { %v1238_v25 = vpop.f32.mrb[4].mxu0 }
 0x166   : > { %v445_v26 = vmax.f32 %v1230_v21, %v1238_v25  ;;  %v1242_v27 = vpop.f32.mrb[5].mxu0 }
 0x167   : > { %v443_v28 = vmax.f32 %v1232_v22, %v1242_v27  ;;  %v1246_v29 = vpop.f32.mrb[6].mxu0 }
 0x168   : > { %v446_v30 = vmax.f32 %v1234_v23, %v1246_v29  ;;  %v1250_v31 = vpop.f32.mrb[7].mxu0 }
 0x169   : > { %v444_v32 = vmax.f32 %v1236_v24, %v1250_v31 }
 0x16d   : > { %v1254_v33 = vpop.f32.mrb[8].mxu0 }
 0x16e   : > { %v449_v34 = vmax.f32 %v445_v26, %v1254_v33  ;;  %v1257_v35 = vpop.f32.mrb[9].mxu0 }
 0x16f   : > { %v447_v36 = vmax.f32 %v443_v28, %v1257_v35  ;;  %v1260_v37 = vpop.f32.mrb[10].mxu0 }
 0x170   : > { %v450_v38 = vmax.f32 %v446_v30, %v1260_v37  ;;  %v1263_v39 = vpop.f32.mrb[11].mxu0 }
 0x171   : > { %v448_v40 = vmax.f32 %v444_v32, %v1263_v39 }
 0x175   : > { %v1266_v41 = vpop.f32.mrb[12].mxu0 }
 0x176   : > { %v453_v42 = vmax.f32 %v449_v34, %v1266_v41  ;;  %v1269_v43 = vpop.f32.mrb[13].mxu0 }
 0x177   : > { %v451_v44 = vmax.f32 %v447_v36, %v1269_v43  ;;  %v1272_v45 = vpop.f32.mrb[14].mxu0 }
 0x178   : > { %v454_v46 = vmax.f32 %v450_v38, %v1272_v45  ;;  %v1275_v47 = vpop.f32.mrb[15].mxu0 }
 0x179   : > { %v452_v48 = vmax.f32 %v448_v40, %v1275_v47 }
 0x17d   : > { %v1278_v49 = vpop.f32.mrb[0].mxu1 }
 0x17e   : > { %v457_v50 = vmax.f32 %v453_v42, %v1278_v49  ;;  %v1281_v51 = vpop.f32.mrb[1].mxu1 }
 0x17f   : > { %v455_v52 = vmax.f32 %v451_v44, %v1281_v51  ;;  %v1284_v53 = vpop.f32.mrb[2].mxu1 }
 0x180   : > { %v458_v54 = vmax.f32 %v454_v46, %v1284_v53  ;;  %v1287_v55 = vpop.f32.mrb[3].mxu1 }
 0x181   : > { %v456_v56 = vmax.f32 %v452_v48, %v1287_v55 }
 0x185   : > { %v1290_v57 = vpop.f32.mrb[4].mxu1 }
 0x186   : > { %v461_v58 = vmax.f32 %v457_v50, %v1290_v57  ;;  %v1293_v59 = vpop.f32.mrb[5].mxu1 }
 0x187   : > { %v459_v60 = vmax.f32 %v455_v52, %v1293_v59  ;;  %v1296_v61 = vpop.f32.mrb[6].mxu1 }
 0x188   : > { %v462_v62 = vmax.f32 %v458_v54, %v1296_v61  ;;  %v1299_v63 = vpop.f32.mrb[7].mxu1 }
 0x189   : > { %v460_v0 = vmax.f32 %v456_v56, %v1299_v63 }
 0x18d   : > { %v1302_v1 = vpop.f32.mrb[8].mxu1 }
 0x18e   : > { %v465_v2 = vmax.f32 %v461_v58, %v1302_v1  ;;  %v1305_v3 = vpop.f32.mrb[9].mxu1 }
 0x18f   : > { %v463_v4 = vmax.f32 %v459_v60, %v1305_v3  ;;  %v1308_v5 = vpop.f32.mrb[10].mxu1 }
 0x190   : > { %v466_v6 = vmax.f32 %v462_v62, %v1308_v5  ;;  %v1311_v7 = vpop.f32.mrb[11].mxu1 }
 0x191   : > { %v464_v8 = vmax.f32 %v460_v0, %v1311_v7 }
 0x195   : > { %v1314_v9 = vpop.f32.mrb[12].mxu1 }
 0x196   : > { %v469_v10 = vmax.f32 %v465_v2, %v1314_v9  ;;  %v1317_v11 = vpop.f32.mrb[13].mxu1 }
 0x197   : > { %v467_v12 = vmax.f32 %v463_v4, %v1317_v11  ;;  %v1320_v13 = vpop.f32.mrb[14].mxu1 }
 0x198   : > { %v470_v14 = vmax.f32 %v466_v6, %v1320_v13  ;;  %v1323_v15 = vpop.f32.mrb[15].mxu1 }
 0x199   : > { %v468_v16 = vmax.f32 %v464_v8, %v1323_v15 }
 0x19a   : > { %v472_v17 = vmax.f32 %v469_v10, %v470_v14 }
 0x19b   : > { %v471_v18 = vmax.f32 %v467_v12, %v468_v16 }
 0x19d   : > { %v473_v19 = vmax.f32 %v471_v18, %v472_v17 }
 0x19f   : > { %v474_v20 = vrot.slane %v473_v19, 4 }
 0x1a1   : > { %v475_v26 = vmax.f32 %v473_v19, %v474_v20 }
 0x1a3   : > { %v476_v28 = vrot.slane %v475_v26, 2 }
 0x1a5   : > { %v477_v30 = vmax.f32 %v475_v26, %v476_v28 }
 0x1a7   : > { %v478_v32 = vrot.slane %v477_v30, 1 }
 0x1a9   : > { %v1326_v34 = vmax.f32 %v477_v30, %v478_v32 }
 0x1ab   : > { %v480_v36 = vsub.f32 %v1232_v22, %v1326_v34  ;;  %v481_v38 = vsub.f32 %v1236_v24, %v1326_v34  ;;  %v482_v40 = vsub.f32 %v1230_v21, %v1326_v34  ;;  %v483_v42 = vsub.f32 %v1234_v23, %v1326_v34 }
 0x1ac   : > { %v484_v44 = vsub.f32 %v1242_v27, %v1326_v34  ;;  %v485_v46 = vsub.f32 %v1250_v31, %v1326_v34  ;;  %v486_v48 = vsub.f32 %v1238_v25, %v1326_v34  ;;  %v487_v22 = vsub.f32 %v1246_v29, %v1326_v34 }
 0x1ad   : > { %v488_v24 = vsub.f32 %v1257_v35, %v1326_v34  ;;  %v489_v21 = vsub.f32 %v1263_v39, %v1326_v34  ;;  %v490_v23 = vsub.f32 %v1254_v33, %v1326_v34  ;;  %v491_v27 = vsub.f32 %v1260_v37, %v1326_v34 }
 0x1ae   : > { %v492_v31 = vsub.f32 %v1269_v43, %v1326_v34  ;;  %v493_v25 = vsub.f32 %v1275_v47, %v1326_v34  ;;  %v494_v29 = vsub.f32 %v1266_v41, %v1326_v34  ;;  %v495_v35 = vsub.f32 %v1272_v45, %v1326_v34 }
 0x1af   : > { %v496_v39 = vsub.f32 %v1281_v51, %v1326_v34  ;;  %v497_v33 = vsub.f32 %v1287_v55, %v1326_v34  ;;  %v498_v37 = vsub.f32 %v1278_v49, %v1326_v34  ;;  %v499_v43 = vsub.f32 %v1284_v53, %v1326_v34 }
 0x1b0   : > { %v500_v47 = vsub.f32 %v1293_v59, %v1326_v34  ;;  %v501_v41 = vsub.f32 %v1299_v63, %v1326_v34  ;;  %v502_v45 = vsub.f32 %v1290_v57, %v1326_v34  ;;  %v503_v50 = vsub.f32 %v1296_v61, %v1326_v34 }
 0x1b1   : > { %v504_v52 = vsub.f32 %v1305_v3, %v1326_v34  ;;  %v505_v54 = vsub.f32 %v1311_v7, %v1326_v34  ;;  %v506_v56 = vsub.f32 %v1302_v1, %v1326_v34  ;;  %v507_v58 = vsub.f32 %v1308_v5, %v1326_v34 }
 0x1b2   : > { %v508_v60 = vsub.f32 %v1317_v11, %v1326_v34  ;;  %v509_v62 = vsub.f32 %v1323_v15, %v1326_v34  ;;  %v510_v0 = vsub.f32 %v1314_v9, %v1326_v34  ;;  %v511_v2 = vsub.f32 %v1320_v13, %v1326_v34 }
 0x1b3   : > { %v512_v4 = vmul.f32 1.442695, %v480_v36  ;;  %v514_v6 = vmul.f32 1.442695, %v481_v38  ;;  %v516_v8 = vmul.f32 1.442695, %v482_v40 }
 0x1b4   : > { %v518_v10 = vmul.f32 1.442695, %v483_v42  ;;  %v520_v12 = vmul.f32 1.442695, %v484_v44  ;;  %v522_v14 = vmul.f32 1.442695, %v485_v46 }
 0x1b5   : > { %952 = vpow2.f32 %v512_v4  ;;  %v524_v16 = vmul.f32 1.442695, %v486_v48  ;;  %v526_v17 = vmul.f32 1.442695, %v487_v22  ;;  %v528_v20 = vmul.f32 1.442695, %v488_v24 }
 0x1b6   : > { %954 = vpow2.f32 %v514_v6  ;;  %v530_v30 = vmul.f32 1.442695, %v489_v21  ;;  %v532_v38 = vmul.f32 1.442695, %v490_v23  ;;  %v534_v44 = vmul.f32 1.442695, %v491_v27 }
 0x1b7   : > { %956 = vpow2.f32 %v516_v8  ;;  %v536_v22 = vmul.f32 1.442695, %v492_v31  ;;  %v538_v4 = vmul.f32 1.442695, %v493_v25  ;;  %v540_v8 = vmul.f32 1.442695, %v494_v29 }
 0x1b8   : > { %958 = vpow2.f32 %v518_v10  ;;  %v544_v25 = vmul.f32 1.442695, %v496_v39  ;;  %v546_v29 = vmul.f32 1.442695, %v497_v33 }
 0x1b9   : > { %960 = vpow2.f32 %v520_v12  ;;  %v542_v12 = vmul.f32 1.442695, %v495_v35 }
 0x1ba   : > { %962 = vpow2.f32 %v522_v14 }
 0x1bb   : > { %964 = vpow2.f32 %v524_v16 }
 0x1bc   : > { %966 = vpow2.f32 %v526_v17 }
 0x1bd   : > { %968 = vpow2.f32 %v528_v20 }
 0x1be   : > { %970 = vpow2.f32 %v530_v30  ;;  %v550_v30 = vmul.f32 1.442695, %v499_v43 }
 0x1bf   : > { %v1392_v18 = vpop.eup %952  ;;  %972 = vpow2.f32 %v532_v38  ;;  %v554_v38 = vmul.f32 1.442695, %v501_v41 }
 0x1c0   : > { %v1394_v19 = vpop.eup %954  ;;  %974 = vpow2.f32 %v534_v44  ;;  %v558_v44 = vmul.f32 1.442695, %v503_v50 }
 0x1c1   : > { %v576_v26 = vadd.f32 %v1394_v19, %v1392_v18  ;;  %v1398_v28 = vpop.eup %956  ;;  %976 = vpow2.f32 %v536_v22  ;;  %v562_v22 = vmul.f32 1.442695, %v505_v54 }
 0x1c2   : > { %v1401_v36 = vpop.eup %958  ;;  %978 = vpow2.f32 %v538_v4  ;;  %v566_v4 = vmul.f32 1.442695, %v507_v58 }
 0x1c3   : > { %v577_v32 = vadd.f32 %v1398_v28, %v576_v26  ;;  %v1404_v42 = vpop.eup %960  ;;  %980 = vpow2.f32 %v540_v8  ;;  %v548_v26 = vmul.f32 1.442695, %v498_v37  ;;  %v570_v8 = vmul.f32 1.442695, %v509_v62 }
 0x1c4   : > { %v1407_v48 = vpop.eup %962  ;;  %982 = vpow2.f32 %v542_v12  ;;  %v574_v12 = vmul.f32 1.442695, %v511_v2 }
 0x1c5   : > { %v578_v40 = vadd.f32 %v1401_v36, %v577_v32  ;;  %v1410_v21 = vpop.eup %964  ;;  %984 = vpow2.f32 %v544_v25  ;;  %v552_v32 = vmul.f32 1.442695, %v500_v47 }
 0x1c6   : > { %v1413_v6 = vpop.eup %966  ;;  %986 = vpow2.f32 %v546_v29 }
 0x1c7   : > { %v579_v46 = vadd.f32 %v1404_v42, %v578_v40  ;;  %v1416_v10 = vpop.eup %968  ;;  %988 = vpow2.f32 %v548_v26  ;;  %v556_v40 = vmul.f32 1.442695, %v502_v45 }
 0x1c8   : > { %v1419_v14 = vpop.eup %970  ;;  %990 = vpow2.f32 %v550_v30 }
 0x1c9   : > { %v580_v24 = vadd.f32 %v1407_v48, %v579_v46  ;;  %v1425_v17 = vpop.eup %972  ;;  %992 = vpow2.f32 %v552_v32  ;;  %v560_v46 = vmul.f32 1.442695, %v504_v52 }
 0x1ca   : > { %v1431_v20 = vpop.eup %974  ;;  %994 = vpow2.f32 %v554_v38 }
 0x1cb   : > { %v581_v23 = vadd.f32 %v1410_v21, %v580_v24  ;;  %v1437_v39 = vpop.eup %976  ;;  %996 = vpow2.f32 %v556_v40  ;;  %v564_v24 = vmul.f32 1.442695, %v506_v56 }
 0x1cc   : > { %v1443_v33 = vpop.eup %978  ;;  %998 = vpow2.f32 %v558_v44 }
 0x1cd   : > { %v582_v27 = vadd.f32 %v1413_v6, %v581_v23  ;;  %v1449_v37 = vpop.eup %980  ;;  %1000 = vpow2.f32 %v560_v46  ;;  %v568_v23 = vmul.f32 1.442695, %v508_v60 }
 0x1ce   : > { %v1455_v43 = vpop.eup %982  ;;  %1002 = vpow2.f32 %v562_v22 }
 0x1cf   : > { %v583_v31 = vadd.f32 %v1416_v10, %v582_v27  ;;  %v1461_v47 = vpop.eup %984  ;;  %1004 = vpow2.f32 %v564_v24  ;;  %v572_v27 = vmul.f32 1.442695, %v510_v0 }
 0x1d0   : > { %v1467_v41 = vpop.eup %986  ;;  %1006 = vpow2.f32 %v566_v4 }
 0x1d1   : > { %v584_v16 = vadd.f32 %v1419_v14, %v583_v31  ;;  %v1473_v45 = vpop.eup %988  ;;  %1008 = vpow2.f32 %v568_v23 }
 0x1d2   : > { %v1479_v50 = vpop.eup %990  ;;  %1010 = vpow2.f32 %v570_v8 }
 0x1d3   : > { %v585_v35 = vadd.f32 %v1425_v17, %v584_v16  ;;  %v1485_v52 = vpop.eup %992  ;;  %1012 = vpow2.f32 %v572_v27 }
 0x1d4   : > { %v1491_v54 = vpop.eup %994  ;;  %1014 = vpow2.f32 %v574_v12 }
 0x1d5   : > { %v586_v51 = vadd.f32 %v1431_v20, %v585_v35  ;;  %v1497_v56 = vpop.eup %996 }
 0x1d6   : > { %v1503_v58 = vpop.eup %998 }
 0x1d7   : > { %v587_v55 = vadd.f32 %v1437_v39, %v586_v51  ;;  %v1509_v60 = vpop.eup %1000 }
 0x1d8   : > { %v1515_v62 = vpop.eup %1002 }
 0x1d9   : > { %v588_v49 = vadd.f32 %v1443_v33, %v587_v55  ;;  %v1518_v25 = vpop.eup %1004 }
 0x1da   : > { %v1521_v0 = vpop.eup %1006 }
 0x1db   : > { %v589_v53 = vadd.f32 %v1449_v37, %v588_v49  ;;  %v1524_v29 = vpop.eup %1008 }
 0x1dc   : > { %v1011_v34 = vpop.eup %1010 }
 0x1dd   : > { %v590_v59 = vadd.f32 %v1455_v43, %v589_v53  ;;  %v1527_v35 = vpop.eup %1012 }
 0x1de   : > { %v1530_v51 = vpop.eup %1014 }
 0x1df   : > { %v591_v63 = vadd.f32 %v1461_v47, %v590_v59 }
 0x1e1   : > { %v592_v57 = vadd.f32 %v1467_v41, %v591_v63 }
 0x1e3   : > { %v593_v61 = vadd.f32 %v1473_v45, %v592_v57 }
 0x1e5   : > { %v594_v3 = vadd.f32 %v1479_v50, %v593_v61 }
 0x1e7   : > { %v595_v7 = vadd.f32 %v1485_v52, %v594_v3 }
 0x1e9   : > { %v596_v1 = vadd.f32 %v1491_v54, %v595_v7 }
 0x1eb   : > { %v597_v5 = vadd.f32 %v1497_v56, %v596_v1 }
 0x1ed   : > { %v598_v11 = vadd.f32 %v1503_v58, %v597_v5 }
 0x1ef   : > { %v599_v15 = vadd.f32 %v1509_v60, %v598_v11 }
 0x1f1   : > { %v600_v31 = vadd.f32 %v1515_v62, %v599_v15 }
 0x1f3   : > { %v601_v9 = vadd.f32 %v1518_v25, %v600_v31 }
 0x1f5   : > { %v602_v16 = vadd.f32 %v1521_v0, %v601_v9 }
 0x1f7   : > { %v603_v13 = vadd.f32 %v1524_v29, %v602_v16 }
 0x1f9   : > { %v604_v2 = vadd.f32 %v1011_v34, %v603_v13 }
 0x1fb   : > { %v605_v26 = vadd.f32 %v1527_v35, %v604_v2 }
 0x1fd   : > { %v606_v30 = vadd.f32 %v1530_v51, %v605_v26 }
 0x1ff   : > { %v607_v55 = vrot.slane %v606_v30, 4 }
 0x201   : > { %v608_v32 = vadd.f32 %v607_v55, %v606_v30 }
 0x203   : > { %v609_v49 = vrot.slane %v608_v32, 2 }
 0x205   : > { %v610_v38 = vadd.f32 %v609_v49, %v608_v32 }
 0x207   : > { %v611_v53 = vrot.slane %v610_v38, 1 }
 0x209   : > { %v612_v40 = vadd.f32 %v611_v53, %v610_v38 }
 0x20b   : > { %1016 = vrcp.f32 %v612_v40 }
 0x215   : > { %v1017_v59 = vpop.eup %1016 }
 0x216   : > { %v643_v44 = vmul.f32 %v1017_v59, %v1011_v34  ;;  %v614_v63 = vmul.f32 %v1017_v59, %v1392_v18  ;;  %v615_v46 = vmul.f32 %v1017_v59, %v1394_v19  ;;  %v616_v57 = vmul.f32 %v1017_v59, %v1398_v28 }
 0x217   : > { %v617_v22 = vmul.f32 %v1017_v59, %v1401_v36  ;;  %v618_v61 = vmul.f32 %v1017_v59, %v1404_v42  ;;  %v619_v24 = vmul.f32 %v1017_v59, %v1407_v48  ;;  %v620_v3 = vmul.f32 %v1017_v59, %v1410_v21 }
 0x218   : > { %675 = vst [vmem:[%s1547_s29 + $0xe8] sm:$0xff] %v643_v44  ;;  %v621_v18 = vmul.f32 %v1017_v59, %v1413_v6  ;;  %v622_v19 = vmul.f32 %v1017_v59, %v1416_v10  ;;  %v623_v28 = vmul.f32 %v1017_v59, %v1419_v14  ;;  %v624_v36 = vmul.f32 %v1017_v59, %v1425_v17 }
 0x219   : > { %646 = vst [vmem:[%s1547_s29] sm:$0xff] %v614_v63  ;;  %647 = vst [vmem:[%s1547_s29 + $0x8] sm:$0xff] %v615_v46  ;;  %v625_v42 = vmul.f32 %v1017_v59, %v1431_v20  ;;  %v626_v48 = vmul.f32 %v1017_v59, %v1437_v39  ;;  %v627_v21 = vmul.f32 %v1017_v59, %v1443_v33 }
 0x21a   : > { %648 = vst [vmem:[%s1547_s29 + $0x10] sm:$0xff] %v616_v57  ;;  %v628_v6 = vmul.f32 %v1017_v59, %v1449_v37  ;;  %649 = vst [vmem:[%s1547_s29 + $0x18] sm:$0xff] %v617_v22  ;;  %v629_v10 = vmul.f32 %v1017_v59, %v1455_v43  ;;  %v630_v14 = vmul.f32 %v1017_v59, %v1461_v47 }
 0x21b   : > { %650 = vst [vmem:[%s1547_s29 + $0x20] sm:$0xff] %v618_v61  ;;  %651 = vst [vmem:[%s1547_s29 + $0x28] sm:$0xff] %v619_v24  ;;  %v631_v17 = vmul.f32 %v1017_v59, %v1467_v41  ;;  %v632_v20 = vmul.f32 %v1017_v59, %v1473_v45  ;;  %v633_v39 = vmul.f32 %v1017_v59, %v1479_v50 }
 0x21c   : > { %652 = vst [vmem:[%s1547_s29 + $0x30] sm:$0xff] %v620_v3  ;;  %653 = vst [vmem:[%s1547_s29 + $0x38] sm:$0xff] %v621_v18  ;;  %v634_v33 = vmul.f32 %v1017_v59, %v1485_v52  ;;  %v635_v37 = vmul.f32 %v1017_v59, %v1491_v54  ;;  %v636_v43 = vmul.f32 %v1017_v59, %v1497_v56 }
 0x21d   : > { %654 = vst [vmem:[%s1547_s29 + $0x40] sm:$0xff] %v622_v19  ;;  %655 = vst [vmem:[%s1547_s29 + $0x48] sm:$0xff] %v623_v28  ;;  %v637_v47 = vmul.f32 %v1017_v59, %v1503_v58  ;;  %v638_v41 = vmul.f32 %v1017_v59, %v1509_v60  ;;  %v639_v45 = vmul.f32 %v1017_v59, %v1515_v62 }
 0x21e   : > { %656 = vst [vmem:[%s1547_s29 + $0x50] sm:$0xff] %v624_v36  ;;  %657 = vst [vmem:[%s1547_s29 + $0x58] sm:$0xff] %v625_v42  ;;  %v640_v50 = vmul.f32 %v1017_v59, %v1518_v25  ;;  %v641_v52 = vmul.f32 %v1017_v59, %v1521_v0  ;;  %v642_v4 = vmul.f32 %v1017_v59, %v1524_v29 }
 0x21f   : > { %658 = vst [vmem:[%s1547_s29 + $0x60] sm:$0xff] %v626_v48  ;;  %659 = vst [vmem:[%s1547_s29 + $0x68] sm:$0xff] %v627_v21  ;;  %v644_v7 = vmul.f32 %v1017_v59, %v1527_v35  ;;  %v645_v54 = vmul.f32 %v1017_v59, %v1530_v51 }
 0x220   : > { %660 = vst [vmem:[%s1547_s29 + $0x70] sm:$0xff] %v628_v6  ;;  %661 = vst [vmem:[%s1547_s29 + $0x78] sm:$0xff] %v629_v10 }
 0x221   : > { %662 = vst [vmem:[%s1547_s29 + $0x80] sm:$0xff] %v630_v14  ;;  %663 = vst [vmem:[%s1547_s29 + $0x88] sm:$0xff] %v631_v17 }
 0x222   : > { %664 = vst [vmem:[%s1547_s29 + $0x90] sm:$0xff] %v632_v20  ;;  %665 = vst [vmem:[%s1547_s29 + $0x98] sm:$0xff] %v633_v39 }
 0x223   : > { %666 = vst [vmem:[%s1547_s29 + $0xa0] sm:$0xff] %v634_v33  ;;  %667 = vst [vmem:[%s1547_s29 + $0xa8] sm:$0xff] %v635_v37 }
 0x224   : > { %668 = vst [vmem:[%s1547_s29 + $0xb0] sm:$0xff] %v636_v43  ;;  %669 = vst [vmem:[%s1547_s29 + $0xb8] sm:$0xff] %v637_v47 }
 0x225   : > { %670 = vst [vmem:[%s1547_s29 + $0xc0] sm:$0xff] %v638_v41  ;;  %671 = vst [vmem:[%s1547_s29 + $0xc8] sm:$0xff] %v639_v45 }
 0x226   : > { %672 = vst [vmem:[%s1547_s29 + $0xd0] sm:$0xff] %v640_v50  ;;  %673 = vst [vmem:[%s1547_s29 + $0xd8] sm:$0xff] %v641_v52 }
 0x227   : > { %674 = vst [vmem:[%s1547_s29 + $0xe0] sm:$0xff] %v642_v4  ;;  %676 = vst [vmem:[%s1547_s29 + $0xf0] sm:$0xff] %v644_v7 }
 0x228   : > { %677 = vst [vmem:[%s1547_s29 + $0xf8] sm:$0xff] %v645_v54 }
 0x229   : > { %1031 = shalt.err (!%p1028_p7)
}
 0x22a   : > { %s1032_s18 = scalar_lea.hbm %s1596_s4, 4096  ;;  %s1036_s25 = scalar_lea.hbm %s1670_s2, 16384 }
 0x22b   : > { %p1033_p9 = scmp.ne.s32.totalorder %s1596_s4, %s1032_s18  ;;  %p1037_p12 = scmp.lt.u32.totalorder %s1596_s4, %s1670_s2 }
 0x22c   : > { %p1038_p13 = scmp.lt.u32.totalorder %s1036_s25, %s1032_s18  ;;  %p1040_p1 = scmp.lt.u32.totalorder %s1032_s18, %s1596_s4 }
 0x22d   : > { %p1034_p10 = pnand %p1033_p9, %p1184_p3 }
 0x22e   : > { %p1039_p0 = por %p1038_p13, %p1037_p12 }
 0x22f   : > { %p1035_p11 = pneg %p1034_p10 }
 0x230   : > { %p1041_p2 = por %p1040_p1, %p1039_p0 }
 0x232   : > { %p1042_p4 = pnand %p1041_p2, %p1035_p11 }
 0x234   : > { %1045 = shalt.err (!%p1042_p4)
}
 0x235   : > { %s1115_s29 = smov 128   ;;  %s1116_s13 = smov 256  }
 0x236   : > { %s1117_s30 = smov 8  }
 0x237   : > { %875 = dma.vmem_to_hbm [thread:$0]  (%p1184_p3), %s1583_s12, 4096, %s1596_s4, %s1616_s5, %s1115_s29, %s1116_s13, %s1117_s30  }
 0x238 PF: > { %p881_p5 = scmp.ge.s32.totalorder %s1112_s16, 2  ;;  %s708_s3 = sand.u32 1, %s1084_s9  }
 0x239   : > { %s709_s6 = scalar_lea.sflag [#allocation3], %s708_s3 }
 0x23a   : > { %p878_p6 = pnand %p881_p5, %p1193_p8 }
 0x23c   : > { %1079 = dma.done.wait (!%p878_p6), %s709_s6, 4096  }
 0x23d   : > { %1081 = vsyncadd (!%p878_p6), %s709_s6, 4294963200  ;;  %s15_s16 = sadd.s32 1, %s1112_s16   ;;  %s1673_s9 = smov %s1088_s10 }
 0x23e   : > { %p12_p7 = scmp.ge.s32.totalorder %s15_s16, 6   ;;  %s1674_s10 = smov %s1092_s11 }
 0x23f   : > { %s1675_s11 = smov %s1202_s27  ;;  %s1676_s12 = smov %s1104_s14 }
 0x240   : > { %s1677_s13 = smov %s1108_s15  ;;  %s1678_s14 = smov %s1681_s19 }
 0x241   : > { %s1679_s15 = smov %s1685_s20  ;;  %14 = sbr.rel (!%p12_p7) target bundleno = 5 (0x5), region = 66 }
 0x248   :  { %714 = vsyncpa [#allocation3], 1 }
 0x249   :  { %716 = vsyncpa [#allocation3 + $0x1], 1 }

</bundles_post_ra>
